<compile_context>
chip_gen: v5e
topology: v5e:2x2
jax: 0.10.0
libtpu: 0.0.40
codegen_flags: <defaults>
</compile_context>

<pallas_src>
import jax
import jax.numpy as jnp
from jax.experimental import pallas as pl
from jax.experimental.pallas import tpu as pltpu


def _round_up(v, m):
    return (v + m - 1) // m * m


def _pick_tile(padded_dim, granule, cap):
    """Largest multiple of `granule` that divides `padded_dim` and is <= cap."""
    best = granule
    t = granule
    limit = min(padded_dim, max(cap, granule))
    while t <= limit:
        if padded_dim % t == 0:
            best = t
        t += granule
    return best


# ---------------------------------------------------------------------------
# Kernels
# ---------------------------------------------------------------------------

def _linear_kernel_fullk(x_ref, wt_ref, b_ref, o_ref):
    # Full reduction in one tile: x (tm, Dp), wt (Dp, tn), b (1, tn), o (tm, tn).
    # No accumulator scratch, no grid revisits of the output block.
    o_ref[...] = (
        jnp.dot(x_ref[...], wt_ref[...], preferred_element_type=jnp.float32)
        + b_ref[...]
    ).astype(o_ref.dtype)


def _linear_kernel_acc(x_ref, wt_ref, b_ref, o_ref, acc_ref):
    # Tiled reduction: x (tm, tk), wt (tk, tn), b (1, tn), o (tm, tn).
    k = pl.program_id(2)

    @pl.when(k == 0)
    def _():
        acc_ref[...] = jnp.zeros_like(acc_ref)

    acc_ref[...] += jnp.dot(x_ref[...], wt_ref[...],
                            preferred_element_type=jnp.float32)

    @pl.when(k == pl.num_programs(2) - 1)
    def _():
        o_ref[...] = (acc_ref[...] + b_ref[...]).astype(o_ref.dtype)


# ---------------------------------------------------------------------------
# Wrapper
# ---------------------------------------------------------------------------

def _linear_apply(x, wt_p, b_p, num_classes, *,
                  tm_max=512, tn_max=512, tk_max=2048, use_bf16=False):
    """y = x @ W^T + b given pre-padded, K-major weight wt_p (Dp, Cp)."""
    B, D = x.shape
    Dp, Cp = wt_p.shape
    assert _round_up(D, 128) == Dp, "weight/in-feature mismatch"
    out_dtype = x.dtype

    Bp = _round_up(B, 8)
    tm = _pick_tile(Bp, 8, tm_max)      # small batch -> full batch, weight streamed once
    tn = _pick_tile(Cp, 128, tn_max)
    tk = _pick_tile(Dp, 128, tk_max)

    # v7x has 2 TensorCores: make sure a "parallel" axis has >= 2 blocks when possible.
    if (Bp // tm) * (Cp // tn) == 1 and Cp >= 256:
        tn = _pick_tile(Cp, 128, Cp // 2)

    xp = x if (Bp == B and Dp == D) else jnp.pad(x, ((0, Bp - B), (0, Dp - D)))
    if use_bf16:
        xp = xp.astype(jnp.bfloat16)
    if xp.dtype != wt_p.dtype:
        xp = xp.astype(wt_p.dtype)

    grid_m, grid_n, grid_k = Bp // tm, Cp // tn, Dp // tk

    cost = pl.CostEstimate(
        flops=2 * Bp * Cp * Dp,
        transcendentals=0,
        bytes_accessed=(xp.size * xp.dtype.itemsize
                        + wt_p.size * wt_p.dtype.itemsize
                        + 4 * (Bp * Cp + Cp)),
    )

    if grid_k == 1:
        # K collapsed: direct write, no scratch, no revisits.
        grid_spec = pltpu.PrefetchScalarGridSpec(
            num_scalar_prefetch=0,
            grid=(grid_m, grid_n),
            in_specs=[
                pl.BlockSpec((tm, Dp), lambda i, j: (i, 0)),   # x
                pl.BlockSpec((Dp, tn), lambda i, j: (0, j)),   # weight^T (K-major)
                pl.BlockSpec((1, tn), lambda i, j: (0, j)),    # bias
            ],
            out_specs=pl.BlockSpec((tm, tn), lambda i, j: (i, j)),
        )
        kernel = _linear_kernel_fullk
        dim_sem = ("parallel", "parallel")
    else:
        grid_spec = pltpu.PrefetchScalarGridSpec(
            num_scalar_prefetch=0,
            grid=(grid_m, grid_n, grid_k),
            in_specs=[
                pl.BlockSpec((tm, tk), lambda i, j, k: (i, k)),   # x
                pl.BlockSpec((tk, tn), lambda i, j, k: (k, j)),   # weight^T (K-major)
                pl.BlockSpec((1, tn), lambda i, j, k: (0, j)),    # bias
            ],
            out_specs=pl.BlockSpec((tm, tn), lambda i, j, k: (i, j)),
            scratch_shapes=[pltpu.VMEM((tm, tn), jnp.float32)],
        )
        kernel = _linear_kernel_acc
        dim_sem = ("parallel", "parallel", "arbitrary")

    out = pl.pallas_call(
        kernel,
        out_shape=jax.ShapeDtypeStruct((Bp, Cp), out_dtype),
        grid_spec=grid_spec,
        compiler_params=pltpu.CompilerParams(
            dimension_semantics=dim_sem,
            vmem_limit_bytes=48 * 1024 * 1024,   # fits v7x's 64 MiB physical VMEM
        ),
        cost_estimate=cost,
    )(xp, wt_p, b_p)

    return out[:B, :num_classes]


class PallasLinear:
    """torch.nn.Linear(input_dimension, num_classes, bias) forward on TPU.

    The weight is padded to lane multiples and pre-transposed to K-major
    (Dp, Cp) ONCE at construction (it is a layer parameter), so the per-call
    path is just an (optional) x pad and a single pallas_call.
    """

    def __init__(self, weight, bias=None, *, tm_max=512, tn_max=512,
                 tk_max=2048, use_bf16=False):
        weight = jnp.asarray(weight)
        C, D = weight.shape
        self.num_classes = C
        self.input_dimension = D
        self._tm_max, self._tn_max, self._tk_max = tm_max, tn_max, tk_max
        self._use_bf16 = use_bf16

        Cp = _round_up(C, 128)
        Dp = _round_up(D, 128)
        wt = jnp.pad(weight, ((0, Cp - C), (0, Dp - D))).T      # (Dp, Cp), K-major
        if use_bf16:
            wt = wt.astype(jnp.bfloat16)
        self.wt = wt
        if bias is None:
            bias = jnp.zeros((C,), dtype=weight.dtype)
        self.b = jnp.pad(jnp.asarray(bias), (0, Cp - C)).reshape(1, Cp).astype(jnp.float32)

    def __call__(self, x):
        return _linear_apply(
            x, self.wt, self.b, self.num_classes,
            tm_max=self._tm_max, tn_max=self._tn_max, tk_max=self._tk_max,
            use_bf16=self._use_bf16,
        )


def linear_layer(x, weight, bias=None, **kwargs):
    """Functional one-shot wrapper: y = x @ weight.T + bias.

    For repeated calls with the same parameters, construct PallasLinear once
    instead (hoists the weight pad/transpose out of the per-call path).
    """
    return PallasLinear(weight, bias, **kwargs)(x)


def _reference(x, weight, bias):
    return x @ weight.T + bias


if __name__ == "__main__":
    key = jax.random.PRNGKey(0)

    # Test 1: small shapes consistent with LinearLayer(input_dimension=32, num_classes=16).
    batch, input_dimension, num_classes = 8, 32, 16
    kx, kw, kb, key = jax.random.split(key, 4)
    bound = 1.0 / (input_dimension ** 0.5)
    weight = jax.random.uniform(kw, (num_classes, input_dimension),
                                minval=-bound, maxval=bound, dtype=jnp.float32)
    bias = jax.random.uniform(kb, (num_classes,),
                              minval=-bound, maxval=bound, dtype=jnp.float32)
    x = jax.random.normal(kx, (batch, input_dimension), dtype=jnp.float32)

    layer = PallasLinear(weight, bias)
    y = jax.block_until_ready(layer(x))
    y_ref = _reference(x, weight, bias)
    assert y.shape == (batch, num_classes)
    assert jnp.allclose(y, y_ref, atol=1e-5, rtol=1e-5)

    # Test 2: non-aligned shapes — full-K collapse path (tk = Dp = 640, tm = Bp = 272,
    # N split into 2 blocks for the v7x megacore heuristic).
    batch2, in_dim2, num_cls2 = 272, 640, 144
    kx2, kw2, kb2, key = jax.random.split(key, 4)
    bound2 = 1.0 / (in_dim2 ** 0.5)
    weight2 = jax.random.uniform(kw2, (num_cls2, in_dim2),
                                 minval=-bound2, maxval=bound2, dtype=jnp.float32)
    bias2 = jax.random.uniform(kb2, (num_cls2,),
                               minval=-bound2, maxval=bound2, dtype=jnp.float32)
    x2 = jax.random.normal(kx2, (batch2, in_dim2), dtype=jnp.float32)

    y2 = jax.block_until_ready(linear_layer(x2, weight2, bias2))
    y2_ref = _reference(x2, weight2, bias2)
    assert y2.shape == (batch2, num_cls2)
    assert jnp.allclose(y2, y2_ref, atol=1e-4, rtol=1e-4)

    # Test 3: force the tiled-K accumulator path (small tile caps) on the same shapes.
    y3 = jax.block_until_ready(
        linear_layer(x2, weight2, bias2, tm_max=128, tn_max=128, tk_max=256))
    assert y3.shape == (batch2, num_cls2)
    assert jnp.allclose(y3, y2_ref, atol=1e-4, rtol=1e-4)

    # Test 4: optional bf16 input path (f32 accumulate + bias), loose tolerance.
    y4 = jax.block_until_ready(linear_layer(x, weight, bias, use_bf16=True))
    assert y4.shape == (batch, num_classes)
    assert jnp.allclose(y4, y_ref, atol=5e-2, rtol=5e-2)

    print("KERNEL_OK")
</pallas_src>

<mosaic_0001>
module attributes {stable_mosaic.version = 11 : i64} {
  func.func @_linear_kernel_fullk(%arg0: i32, %arg1: i32, %arg2: memref<8x128xf32, #tpu.memory_space<vmem>>, %arg3: memref<128x128xf32, #tpu.memory_space<vmem>>, %arg4: memref<1x128xf32, #tpu.memory_space<vmem>>, %arg5: memref<8x128xf32, #tpu.memory_space<vmem>>) attributes {dimension_semantics = [#tpu.dimension_semantics<parallel>, #tpu.dimension_semantics<parallel>], iteration_bounds = array<i64: 1, 1>, scalar_prefetch = 0 : i64, scratch_operands = 0 : i64, tpu.core_type = #tpu.core_type<tc>, window_params = [{transform_indices = @transform_0, window_bounds = array<i64: 8, 128>}, {transform_indices = @transform_1, window_bounds = array<i64: 128, 128>}, {transform_indices = @transform_2, window_bounds = array<i64: 1, 128>}, {transform_indices = @transform_3, window_bounds = array<i64: 8, 128>}]} {
    %c0 = arith.constant 0 : index
    %c0_0 = arith.constant 0 : index
    %0 = vector.load %arg2[%c0, %c0_0] : memref<8x128xf32, #tpu.memory_space<vmem>>, vector<8x128xf32>
    %c0_1 = arith.constant 0 : index
    %c0_2 = arith.constant 0 : index
    %1 = vector.load %arg3[%c0_1, %c0_2] : memref<128x128xf32, #tpu.memory_space<vmem>>, vector<128x128xf32>
    %cst = arith.constant dense<0.000000e+00> : vector<8x128xf32>
    %2 = tpu.matmul %0, %1, %cst {dimension_numbers = #tpu.dot_dimension_numbers<[1], [0], [0], [1], [0, 0, 1, 1], [], []>} : vector<8x128xf32>, vector<128x128xf32>, vector<8x128xf32> -> vector<8x128xf32>
    %c0_3 = arith.constant 0 : index
    %c0_4 = arith.constant 0 : index
    %3 = vector.load %arg4[%c0_3, %c0_4] : memref<1x128xf32, #tpu.memory_space<vmem>>, vector<1x128xf32>
    %4 = vector.broadcast %3 : vector<1x128xf32> to vector<8x128xf32>
    %5 = arith.addf %2, %4 : vector<8x128xf32>
    %c0_5 = arith.constant 0 : index
    %c0_6 = arith.constant 0 : index
    %6 = vector.load %arg5[%c0_5, %c0_6] : memref<8x128xf32, #tpu.memory_space<vmem>>, vector<8x128xf32>
    tpu.vector_store %arg5[%c0_5, %c0_6], %5 {strides = array<i32>} : memref<8x128xf32, #tpu.memory_space<vmem>>, vector<8x128xf32>,
    return
  }
  func.func @transform_0(%arg0: i32, %arg1: i32) -> (i32, i32) {
    %c0_i32 = arith.constant 0 : i32
    %c0_i32_0 = arith.constant 0 : i32
    return %arg0, %c0_i32 : i32, i32
  }
  func.func @transform_1(%arg0: i32, %arg1: i32) -> (i32, i32) {
    %c0_i32 = arith.constant 0 : i32
    %c0_i32_0 = arith.constant 0 : i32
    return %c0_i32, %arg1 : i32, i32
  }
  func.func @transform_2(%arg0: i32, %arg1: i32) -> (i32, i32) {
    %c0_i32 = arith.constant 0 : i32
    %c0_i32_0 = arith.constant 0 : i32
    return %c0_i32, %arg1 : i32, i32
  }
  func.func @transform_3(%arg0: i32, %arg1: i32) -> (i32, i32) {
    %c0_i32 = arith.constant 0 : i32
    return %arg0, %arg1 : i32, i32
  }
}

</mosaic_0001>

<bundles_post_ra>
// kernel: tpu_custom_call.1
= control target key start
LH: loop header
LB: loop body
LE: loop exit
PB: predicated region body
PF: predicated region fallthrough
CT: control target
= control target key end

     0   :  { %8 = vsyncpa [#allocation3], 0  ;;  %s226_s0 = inlined_call_operand.hbm [shape: f32[8,128], index: 0, kind: input, shape index: {}]   ;;  %s227_s1 = inlined_call_operand.hbm [shape: f32[128,128], index: 1, kind: input, shape index: {}]   ;;  %s228_s2 = inlined_call_operand.vmem [shape: f32[1,128], index: 2, kind: input, shape index: {}]   ;;  %s229_s3 = inlined_call_operand.hbm [shape: f32[8,128], index: 3, kind: output, shape index: {}]  }
   0x1   :  { %9 = vsyncpa [#allocation6], 0 }
   0x2   :  { %10 = vsyncpa [#allocation4], 0  ;;  %s16_s14 = sshll.u32 %s226_s0, 4  ;;  %s189_s15 = smov [#allocation2]   ;;  %s17_s14 = int_to_ptr.hbm [resolvable:$true] %s16_s14 }
   0x3   :  { %s18_s16 = sshll.u32 %s189_s15, 4  ;;  %s26_s19 = sshll.u32 %s227_s1, 4  ;;  %s19_s16 = int_to_ptr.vmem [resolvable:$true] %s18_s16  ;;  %s27_s19 = int_to_ptr.hbm [resolvable:$true] %s26_s19 }
   0x4   :  { %21 = dma.hbm_to_vmem [thread:$0]  %s17_s14, 128, %s19_s16, [#allocation3]  }
   0x5   :  { %s190_s20 = smov [#allocation5]   ;;  %s191_s22 = smov 128  }
   0x6   :  { %s28_s21 = sshll.u32 %s190_s20, 4  ;;  %s192_s23 = smov 8   ;;  %s29_s21 = int_to_ptr.vmem [resolvable:$true] %s28_s21 }
   0x7   :  { %34 = dma.hbm_to_vmem [thread:$0]  %s27_s19, 2048, %s29_s21, [#allocation6], %s191_s22, %s191_s22, %s192_s23  }
   0x8   :  { %183 = dma.done.wait [#allocation3], 128  }
   0x9   :  { %184 = vsyncadd [#allocation3], 4294967168 }
   0xa   :  { %185 = dma.done.wait [#allocation6], 2048  }
   0xb   :  { %186 = vsyncadd [#allocation6], 4294965248  ;;  %v61_v0 = vld [vmem:[#allocation5 + $0x78] sm:$0xff]  ;;  %v60_v1 = vld [vmem:[#allocation5 + $0x70] sm:$0xff]  ;;  %s193_s24 = smov [#allocation7]   ;;  %s94_s28 = sshll.u32 %s229_s3, 4  ;;  %s95_s28 = int_to_ptr.hbm [resolvable:$true] %s94_s28 }
   0xc   :  { %66 = vmatpush.msra.mxu0 %v61_v0  ;;  %v59_v2 = vld [vmem:[#allocation5 + $0x68] sm:$0xff]  ;;  %v58_v3 = vld [vmem:[#allocation5 + $0x60] sm:$0xff]  ;;  %v57_v4 = vld [vmem:[#allocation5 + $0x58] sm:$0xff]  ;;  %s92_s25 = sshll.u32 %s193_s24, 4  ;;  %s93_s25 = int_to_ptr.vmem [resolvable:$true] %s92_s25 }
   0xd   :  { %v56_v5 = vld [vmem:[#allocation5 + $0x50] sm:$0xff]  ;;  %v55_v6 = vld [vmem:[#allocation5 + $0x48] sm:$0xff]  ;;  %v54_v7 = vld [vmem:[#allocation5 + $0x40] sm:$0xff] }
   0xe   :  { %67 = vmatpush.msra.mxu0 %v60_v1  ;;  %v53_v8 = vld [vmem:[#allocation5 + $0x38] sm:$0xff]  ;;  %v52_v9 = vld [vmem:[#allocation5 + $0x30] sm:$0xff]  ;;  %v51_v10 = vld [vmem:[#allocation5 + $0x28] sm:$0xff] }
   0xf   :  { %v50_v11 = vld [vmem:[#allocation5 + $0x20] sm:$0xff]  ;;  %v49_v12 = vld [vmem:[#allocation5 + $0x18] sm:$0xff]  ;;  %v48_v13 = vld [vmem:[#allocation5 + $0x10] sm:$0xff] }
  0x10   :  { %68 = vmatpush.msra.mxu0 %v59_v2  ;;  %v47_v14 = vld [vmem:[#allocation5 + $0x8] sm:$0xff]  ;;  %v46_v15 = vld [vmem:[#allocation5] sm:$0xff]  ;;  %v45_v16 = vld [vmem:[#allocation2] sm:$0xff] }
  0x11   :  { %v110_v17 = vld [vmem:[%s228_s2] ss:$0 sm:$0xff] }
  0x12   :  { %69 = vmatpush.msra.mxu0 %v58_v3 }
  0x14   :  { %70 = vmatpush.msra.mxu0 %v57_v4 }
  0x16   :  { %71 = vmatpush.msra.mxu0 %v56_v5 }
  0x18   :  { %72 = vmatpush.msra.mxu0 %v55_v6 }
  0x1a   :  { %73 = vmatpush.msra.mxu0 %v54_v7 }
  0x1c   :  { %74 = vmatpush.msra.mxu0 %v53_v8 }
  0x1e   :  { %75 = vmatpush.msra.mxu0 %v52_v9 }
  0x20   :  { %76 = vmatpush.msra.mxu0 %v51_v10 }
  0x22   :  { %77 = vmatpush.msra.mxu0 %v50_v11 }
  0x24   :  { %78 = vmatpush.msra.mxu0 %v49_v12 }
  0x26   :  { %79 = vmatpush.msra.mxu0 %v48_v13 }
  0x28   :  { %80 = vmatpush.msra.mxu0 %v47_v14 }
  0x2a   :  { %81 = vmatpush.msra.mxu0 %v46_v15 }
  0x2b   :  { %82 = vmatmul.f32.vlgmr.msra.gmra.mxu0 %v45_v16 }
  0xa8   :  { %v83_v18 = vpop.f32.mrf.mxu0 }
  0xa9   :  { %v84_v19 = vadd.f32 %v110_v17, %v83_v18 }
  0xab   :  { %86 = vst [vmem:[#allocation7] sm:$0xff] %v84_v19 }
  0xac   :  { %97 = dma.vmem_to_hbm [thread:$0]  %s93_s25, 128, %s95_s28, [#allocation4]  }
  0xad   :  { %187 = dma.done.wait [#allocation4], 128  }
  0xae   :  { %188 = vsyncadd [#allocation4], 4294967168 }
  0xaf   :  { %102 = vsyncpa [#allocation3], 1 }
  0xb0   :  { %103 = vsyncpa [#allocation6], 1 }
  0xb1   :  { %104 = vsyncpa [#allocation4], 1 }

</bundles_post_ra>
